<compile_context>
chip_gen: v5e
topology: v5e:2x2
jax: 0.10.0
libtpu: 0.0.40
codegen_flags: <defaults>
</compile_context>

<pallas_src>
import jax
import jax.numpy as jnp
from jax.experimental import pallas as pl
from jax.experimental.pallas import tpu as pltpu

LANE = 128     # vreg lane width (last dim)
SUBLANE = 8    # vreg sublane width (second-to-last dim, f32)


def _round_up(n, m):
    return ((n + m - 1) // m) * m


def _pad2d(a, rows, cols, dtype):
    """Zero-pad a 2-D array to (rows, cols) and cast to dtype."""
    a = a.astype(dtype)
    if a.shape == (rows, cols):
        return a
    return jnp.zeros((rows, cols), dtype).at[: a.shape[0], : a.shape[1]].set(a)


def vae_forward_kernel(x_ref, w1_ref, b1_ref, w2mu_ref, b2mu_ref,
                       w2lv_ref, b2lv_ref, eps_ref, out_ref):
    # --- Encoder layer 1: bf16 operands on the MXU, f32 accumulation --------
    h = jnp.dot(x_ref[...], w1_ref[...], preferred_element_type=jnp.float32)
    h = jnp.maximum(h + b1_ref[...], 0.0)            # f32 epilogue (bias + ReLU)
    hb = h.astype(jnp.bfloat16)

    # --- Encoder layer 2: two lane-aligned heads (mu / logvar) --------------
    mu = jnp.dot(hb, w2mu_ref[...], preferred_element_type=jnp.float32) + b2mu_ref[...]
    lv = jnp.dot(hb, w2lv_ref[...], preferred_element_type=jnp.float32) + b2lv_ref[...]

    # --- _reparameterize: f32 epilogue (exp on EUP, fma on VPU) -------------
    std = jnp.exp(0.5 * lv)
    out_ref[...] = eps_ref[...] * std + mu            # lane-dense [TB, Kp] store


def vae_forward(x, w1, b1, w2, b2, eps, batch_tile=None):
    B, D = x.shape
    H = w1.shape[1]
    K = eps.shape[1]
    assert w2.shape == (H, 2 * K) and b2.shape[-1] == 2 * K

    # Split the projection head: mu / logvar as two clean lane-aligned matmuls.
    w2_mu, w2_lv = w2[:, :K], w2[:, K:]
    b2_mu, b2_lv = b2[:, :K], b2[:, K:]

    # Lane padding (last dim -> multiple of 128) and batch tiling.
    Dp = _round_up(D, LANE)
    Hp = _round_up(H, LANE)
    Kp = _round_up(K, LANE)
    if batch_tile is None:
        # Large batch tiles amortize per-step overhead; footprint here is tiny
        # (x/eps/out tiles + resident weights), well under v7x's 64 MiB VMEM.
        batch_tile = min(_round_up(B, SUBLANE), 512)
    TB = batch_tile
    Bp = _round_up(B, TB)

    xp   = _pad2d(x,     Bp, Dp, jnp.bfloat16)   # matmul operand -> bf16 (half DMA)
    w1p  = _pad2d(w1,    Dp, Hp, jnp.bfloat16)
    b1p  = _pad2d(b1,    1,  Hp, jnp.float32)
    w2mp = _pad2d(w2_mu, Hp, Kp, jnp.bfloat16)
    b2mp = _pad2d(b2_mu, 1,  Kp, jnp.float32)
    w2lp = _pad2d(w2_lv, Hp, Kp, jnp.bfloat16)
    b2lp = _pad2d(b2_lv, 1,  Kp, jnp.float32)
    epsp = _pad2d(eps,   Bp, Kp, jnp.float32)    # f32 epilogue operand

    grid = (Bp // TB,)

    def batch_spec(cols):                               # tiles that move with i
        return pl.BlockSpec((TB, cols), lambda i: (i, 0))

    def resident_spec(rows, cols):                      # weights stay put
        return pl.BlockSpec((rows, cols), lambda i: (0, 0))

    cost = pl.CostEstimate(
        flops=Bp * (2 * Dp * Hp + 4 * Hp * Kp + 5 * Kp),
        transcendentals=Bp * Kp,
        bytes_accessed=(xp.size * 2 + w1p.size * 2 + w2mp.size * 2 + w2lp.size * 2
                        + (b1p.size + b2mp.size + b2lp.size) * 4
                        + epsp.size * 4 + Bp * Kp * 4),
    )

    out_padded = pl.pallas_call(
        vae_forward_kernel,
        out_shape=jax.ShapeDtypeStruct((Bp, Kp), jnp.float32),
        grid=grid,
        in_specs=[
            batch_spec(Dp),           # x tile        [TB, Dp]
            resident_spec(Dp, Hp),    # W1            [Dp, Hp]
            resident_spec(1, Hp),     # b1
            resident_spec(Hp, Kp),    # W2_mu
            resident_spec(1, Kp),     # b2_mu
            resident_spec(Hp, Kp),    # W2_logvar
            resident_spec(1, Kp),     # b2_logvar
            batch_spec(Kp),           # eps tile      [TB, Kp]
        ],
        out_specs=batch_spec(Kp),     # lane-dense output slab [TB, Kp]
        compiler_params=pltpu.CompilerParams(
            # Independent batch tiles -> shardable across v7x's 2 TensorCores.
            dimension_semantics=("parallel",),
        ),
        cost_estimate=cost,
    )(xp, w1p, b1p, w2mp, b2mp, w2lp, b2lp, epsp)

    # Un-pad in the wrapper (cheap layout plumbing outside the kernel).
    return out_padded[:B, :K]


def reference_forward_f32(x, w1, b1, w2, b2, eps):
    h = jnp.maximum(x @ w1 + b1, 0.0)
    z = h @ w2 + b2
    k = eps.shape[1]
    mu, logvar = z[:, :k], z[:, k:]
    return eps * jnp.exp(0.5 * logvar) + mu


def reference_forward_bf16(x, w1, b1, w2, b2, eps):
    # Same precision policy as the kernel: bf16 matmul operands, f32 accum/epilogue.
    bf16 = jnp.bfloat16
    h = jnp.dot(x.astype(bf16), w1.astype(bf16),
                preferred_element_type=jnp.float32) + b1
    h = jnp.maximum(h, 0.0)
    z = jnp.dot(h.astype(bf16), w2.astype(bf16),
                preferred_element_type=jnp.float32) + b2
    k = eps.shape[1]
    mu, logvar = z[:, :k], z[:, k:]
    return eps * jnp.exp(0.5 * logvar) + mu


if __name__ == "__main__":
    # Small, VAE-consistent shapes.
    B = 8             # batch
    D_in = 16         # input feature dim
    hidden_dim = 32   # Encoder hidden_dim
    n_components = 8  # latent size K; encoder outputs 2*K

    key = jax.random.PRNGKey(0)
    kx, kw1, kb1, kw2, kb2, keps = jax.random.split(key, 6)

    x = jax.random.normal(kx, (B, D_in), dtype=jnp.float32)
    w1 = jax.random.normal(kw1, (D_in, hidden_dim), dtype=jnp.float32) * 0.1
    b1 = jax.random.normal(kb1, (1, hidden_dim), dtype=jnp.float32) * 0.1
    w2 = jax.random.normal(kw2, (hidden_dim, 2 * n_components), dtype=jnp.float32) * 0.1
    b2 = jax.random.normal(kb2, (1, 2 * n_components), dtype=jnp.float32) * 0.1
    # eps plays the role of torch.randn_like(std) — drawn once, deterministically.
    eps = jax.random.normal(keps, (B, n_components), dtype=jnp.float32)

    out = jax.block_until_ready(vae_forward(x, w1, b1, w2, b2, eps))
    assert out.shape == (B, n_components)

    # Tight check against a reference using the kernel's exact precision policy.
    ref_bf16 = reference_forward_bf16(x, w1, b1, w2, b2, eps)
    assert jnp.allclose(out, ref_bf16, atol=1e-4, rtol=1e-4), "mismatch vs bf16-policy reference"
    # Loose sanity check against the pure-f32 reference.
    ref_f32 = reference_forward_f32(x, w1, b1, w2, b2, eps)
    assert jnp.allclose(out, ref_f32, atol=5e-2, rtol=5e-2), "mismatch vs f32 reference"

    print("KERNEL_OK")
</pallas_src>

<mosaic_0001>
module attributes {stable_mosaic.version = 11 : i64} {
  func.func @vae_forward_kernel(%arg0: i32, %arg1: memref<8x128xbf16, #tpu.memory_space<vmem>>, %arg2: memref<128x128xbf16, #tpu.memory_space<vmem>>, %arg3: memref<1x128xf32, #tpu.memory_space<vmem>>, %arg4: memref<128x128xbf16, #tpu.memory_space<vmem>>, %arg5: memref<1x128xf32, #tpu.memory_space<vmem>>, %arg6: memref<128x128xbf16, #tpu.memory_space<vmem>>, %arg7: memref<1x128xf32, #tpu.memory_space<vmem>>, %arg8: memref<8x128xf32, #tpu.memory_space<vmem>>, %arg9: memref<8x128xf32, #tpu.memory_space<vmem>>) attributes {dimension_semantics = [#tpu.dimension_semantics<parallel>], iteration_bounds = array<i64: 1>, scalar_prefetch = 0 : i64, scratch_operands = 0 : i64, tpu.core_type = #tpu.core_type<tc>, window_params = [{transform_indices = @transform_0, window_bounds = array<i64: 8, 128>}, {pipeline_mode = #tpu.pipeline_mode<synchronous>, transform_indices = @transform_1, window_bounds = array<i64: 128, 128>}, {pipeline_mode = #tpu.pipeline_mode<synchronous>, transform_indices = @transform_2, window_bounds = array<i64: 1, 128>}, {pipeline_mode = #tpu.pipeline_mode<synchronous>, transform_indices = @transform_3, window_bounds = array<i64: 128, 128>}, {pipeline_mode = #tpu.pipeline_mode<synchronous>, transform_indices = @transform_4, window_bounds = array<i64: 1, 128>}, {pipeline_mode = #tpu.pipeline_mode<synchronous>, transform_indices = @transform_5, window_bounds = array<i64: 128, 128>}, {pipeline_mode = #tpu.pipeline_mode<synchronous>, transform_indices = @transform_6, window_bounds = array<i64: 1, 128>}, {transform_indices = @transform_7, window_bounds = array<i64: 8, 128>}, {transform_indices = @transform_8, window_bounds = array<i64: 8, 128>}]} {
    %c0 = arith.constant 0 : index
    %c0_0 = arith.constant 0 : index
    %0 = vector.load %arg1[%c0, %c0_0] : memref<8x128xbf16, #tpu.memory_space<vmem>>, vector<8x128xbf16>
    %c0_1 = arith.constant 0 : index
    %c0_2 = arith.constant 0 : index
    %1 = vector.load %arg2[%c0_1, %c0_2] : memref<128x128xbf16, #tpu.memory_space<vmem>>, vector<128x128xbf16>
    %cst = arith.constant dense<0.000000e+00> : vector<8x128xf32>
    %2 = tpu.matmul %0, %1, %cst {dimension_numbers = #tpu.dot_dimension_numbers<[1], [0], [0], [1], [0, 0, 1, 1], [], []>} : vector<8x128xbf16>, vector<128x128xbf16>, vector<8x128xf32> -> vector<8x128xf32>
    %c0_3 = arith.constant 0 : index
    %c0_4 = arith.constant 0 : index
    %3 = vector.load %arg3[%c0_3, %c0_4] : memref<1x128xf32, #tpu.memory_space<vmem>>, vector<1x128xf32>
    %4 = vector.broadcast %3 : vector<1x128xf32> to vector<8x128xf32>
    %5 = arith.addf %2, %4 : vector<8x128xf32>
    %cst_5 = arith.constant 0.000000e+00 : f32
    %6 = vector.broadcast %cst_5 : f32 to vector<8x128xf32>
    %7 = arith.maximumf %5, %6 : vector<8x128xf32>
    %8 = arith.truncf %7 : vector<8x128xf32> to vector<8x128xbf16>
    %c0_6 = arith.constant 0 : index
    %c0_7 = arith.constant 0 : index
    %9 = vector.load %arg4[%c0_6, %c0_7] : memref<128x128xbf16, #tpu.memory_space<vmem>>, vector<128x128xbf16>
    %cst_8 = arith.constant dense<0.000000e+00> : vector<8x128xf32>
    %10 = tpu.matmul %8, %9, %cst_8 {dimension_numbers = #tpu.dot_dimension_numbers<[1], [0], [0], [1], [0, 0, 1, 1], [], []>} : vector<8x128xbf16>, vector<128x128xbf16>, vector<8x128xf32> -> vector<8x128xf32>
    %c0_9 = arith.constant 0 : index
    %c0_10 = arith.constant 0 : index
    %11 = vector.load %arg5[%c0_9, %c0_10] : memref<1x128xf32, #tpu.memory_space<vmem>>, vector<1x128xf32>
    %12 = vector.broadcast %11 : vector<1x128xf32> to vector<8x128xf32>
    %13 = arith.addf %10, %12 : vector<8x128xf32>
    %c0_11 = arith.constant 0 : index
    %c0_12 = arith.constant 0 : index
    %14 = vector.load %arg6[%c0_11, %c0_12] : memref<128x128xbf16, #tpu.memory_space<vmem>>, vector<128x128xbf16>
    %cst_13 = arith.constant dense<0.000000e+00> : vector<8x128xf32>
    %15 = tpu.matmul %8, %14, %cst_13 {dimension_numbers = #tpu.dot_dimension_numbers<[1], [0], [0], [1], [0, 0, 1, 1], [], []>} : vector<8x128xbf16>, vector<128x128xbf16>, vector<8x128xf32> -> vector<8x128xf32>
    %c0_14 = arith.constant 0 : index
    %c0_15 = arith.constant 0 : index
    %16 = vector.load %arg7[%c0_14, %c0_15] : memref<1x128xf32, #tpu.memory_space<vmem>>, vector<1x128xf32>
    %17 = vector.broadcast %16 : vector<1x128xf32> to vector<8x128xf32>
    %18 = arith.addf %15, %17 : vector<8x128xf32>
    %cst_16 = arith.constant 5.000000e-01 : f32
    %19 = vector.broadcast %cst_16 : f32 to vector<8x128xf32>
    %20 = arith.mulf %19, %18 : vector<8x128xf32>
    %21 = math.exp %20 : vector<8x128xf32>
    %c0_17 = arith.constant 0 : index
    %c0_18 = arith.constant 0 : index
    %22 = vector.load %arg8[%c0_17, %c0_18] : memref<8x128xf32, #tpu.memory_space<vmem>>, vector<8x128xf32>
    %23 = arith.mulf %22, %21 : vector<8x128xf32>
    %24 = arith.addf %23, %13 : vector<8x128xf32>
    %c0_19 = arith.constant 0 : index
    %c0_20 = arith.constant 0 : index
    %25 = vector.load %arg9[%c0_19, %c0_20] : memref<8x128xf32, #tpu.memory_space<vmem>>, vector<8x128xf32>
    tpu.vector_store %arg9[%c0_19, %c0_20], %24 {strides = array<i32>} : memref<8x128xf32, #tpu.memory_space<vmem>>, vector<8x128xf32>,
    return
  }
  func.func @transform_0(%arg0: i32) -> (i32, i32) {
    %c0_i32 = arith.constant 0 : i32
    %c0_i32_0 = arith.constant 0 : i32
    return %arg0, %c0_i32 : i32, i32
  }
  func.func @transform_1(%arg0: i32) -> (i32, i32) {
    %c0_i32 = arith.constant 0 : i32
    %c0_i32_0 = arith.constant 0 : i32
    %c0_i32_1 = arith.constant 0 : i32
    return %c0_i32, %c0_i32_0 : i32, i32
  }
  func.func @transform_2(%arg0: i32) -> (i32, i32) {
    %c0_i32 = arith.constant 0 : i32
    %c0_i32_0 = arith.constant 0 : i32
    %c0_i32_1 = arith.constant 0 : i32
    return %c0_i32, %c0_i32_0 : i32, i32
  }
  func.func @transform_3(%arg0: i32) -> (i32, i32) {
    %c0_i32 = arith.constant 0 : i32
    %c0_i32_0 = arith.constant 0 : i32
    %c0_i32_1 = arith.constant 0 : i32
    return %c0_i32, %c0_i32_0 : i32, i32
  }
  func.func @transform_4(%arg0: i32) -> (i32, i32) {
    %c0_i32 = arith.constant 0 : i32
    %c0_i32_0 = arith.constant 0 : i32
    %c0_i32_1 = arith.constant 0 : i32
    return %c0_i32, %c0_i32_0 : i32, i32
  }
  func.func @transform_5(%arg0: i32) -> (i32, i32) {
    %c0_i32 = arith.constant 0 : i32
    %c0_i32_0 = arith.constant 0 : i32
    %c0_i32_1 = arith.constant 0 : i32
    return %c0_i32, %c0_i32_0 : i32, i32
  }
  func.func @transform_6(%arg0: i32) -> (i32, i32) {
    %c0_i32 = arith.constant 0 : i32
    %c0_i32_0 = arith.constant 0 : i32
    %c0_i32_1 = arith.constant 0 : i32
    return %c0_i32, %c0_i32_0 : i32, i32
  }
  func.func @transform_7(%arg0: i32) -> (i32, i32) {
    %c0_i32 = arith.constant 0 : i32
    %c0_i32_0 = arith.constant 0 : i32
    return %arg0, %c0_i32 : i32, i32
  }
  func.func @transform_8(%arg0: i32) -> (i32, i32) {
    %c0_i32 = arith.constant 0 : i32
    %c0_i32_0 = arith.constant 0 : i32
    return %arg0, %c0_i32 : i32, i32
  }
}

</mosaic_0001>

<bundles_post_ra>
// kernel: tpu_custom_call.1
= control target key start
LH: loop header
LB: loop body
LE: loop exit
PB: predicated region body
PF: predicated region fallthrough
CT: control target
= control target key end

     0   :  { %13 = vsyncpa [#allocation3], 0  ;;  %s741_s0 = inlined_call_operand.hbm [shape: bf16[8,128], index: 0, kind: input, shape index: {}]   ;;  %s742_s1 = inlined_call_operand.hbm [shape: bf16[128,128], index: 1, kind: input, shape index: {}]   ;;  %s743_s2 = inlined_call_operand.vmem [shape: f32[1,128], index: 2, kind: input, shape index: {}]   ;;  %s744_s3 = inlined_call_operand.hbm [shape: bf16[128,128], index: 3, kind: input, shape index: {}]   ;;  %s745_s4 = inlined_call_operand.vmem [shape: f32[1,128], index: 4, kind: input, shape index: {}]   ;;  %s746_s5 = inlined_call_operand.hbm [shape: bf16[128,128], index: 5, kind: input, shape index: {}]   ;;  %s747_s6 = inlined_call_operand.vmem [shape: f32[1,128], index: 6, kind: input, shape index: {}]   ;;  %s748_s7 = inlined_call_operand.hbm [shape: f32[8,128], index: 7, kind: input, shape index: {}]   ;;  %s749_s8 = inlined_call_operand.hbm [shape: f32[8,128], index: 8, kind: output, shape index: {}]  }
   0x1   :  { %14 = vsyncpa [#allocation6], 0 }
   0x2   :  { %15 = vsyncpa [#allocation9], 0  ;;  %s32_s29 = sshll.u32 %s742_s1, 4  ;;  %s33_s29 = int_to_ptr.hbm [resolvable:$true] %s32_s29 }
   0x3   :  { %16 = vsyncpa [#allocation4], 0  ;;  %s661_s30 = smov [#allocation5]   ;;  %s62_s12 = sshll.u32 %s746_s5, 4  ;;  %s63_s12 = int_to_ptr.hbm [resolvable:$true] %s62_s12 }
   0x4   :  { %s34_s9 = sshll.u32 %s661_s30, 4  ;;  %s662_s13 = smov 64   ;;  %s35_s9 = int_to_ptr.vmem [resolvable:$true] %s34_s9 }
   0x5   :  { %s663_s14 = smov 4   ;;  %s664_s15 = smov [#allocation8]  }
   0x6   :  { %40 = dma.hbm_to_vmem [thread:$0]  %s33_s29, 1024, %s35_s9, [#allocation6], %s662_s13, %s662_s13, %s663_s14  }
   0x7   :  { %s64_s16 = sshll.u32 %s664_s15, 4  ;;  %s22_s19 = sshll.u32 %s741_s0, 4  ;;  %s65_s16 = int_to_ptr.vmem [resolvable:$true] %s64_s16  ;;  %s23_s19 = int_to_ptr.hbm [resolvable:$true] %s22_s19 }
   0x8   :  { %70 = dma.hbm_to_vmem [thread:$0]  %s63_s12, 1024, %s65_s16, [#allocation9], %s662_s13, %s662_s13, %s663_s14  }
   0x9   :  { %s47_s21 = sshll.u32 %s744_s3, 4  ;;  %s665_s22 = smov [#allocation2]   ;;  %s48_s21 = int_to_ptr.hbm [resolvable:$true] %s47_s21 }
   0xa   :  { %s24_s23 = sshll.u32 %s665_s22, 4  ;;  %s666_s5 = smov [#allocation7]   ;;  %s25_s23 = int_to_ptr.vmem [resolvable:$true] %s24_s23 }
   0xb   :  { %27 = dma.hbm_to_vmem [thread:$0]  %s23_s19, 64, %s25_s23, [#allocation3]  }
   0xc   :  { %s49_s24 = sshll.u32 %s666_s5, 4  ;;  %s78_s27 = sshll.u32 %s748_s7, 4  ;;  %s50_s24 = int_to_ptr.vmem [resolvable:$true] %s49_s24  ;;  %s79_s27 = int_to_ptr.hbm [resolvable:$true] %s78_s27 }
   0xd   :  { %55 = dma.hbm_to_vmem [thread:$0]  %s48_s21, 1024, %s50_s24, [#allocation6], %s662_s13, %s662_s13, %s663_s14  }
   0xe   :  { %s667_s0 = smov [#allocation10]  }
   0xf   :  { %s80_s28 = sshll.u32 %s667_s0, 4  ;;  %s81_s28 = int_to_ptr.vmem [resolvable:$true] %s80_s28 }
  0x10   :  { %83 = dma.hbm_to_vmem [thread:$0]  %s79_s27, 128, %s81_s28, [#allocation9]  }
  0x11   :  { %653 = dma.done.wait [#allocation3], 64  }
  0x12   :  { %654 = vsyncadd [#allocation3], 4294967232 }
  0x13   :  { %655 = dma.done.wait [#allocation6], 2048  }
  0x14   :  { %656 = vsyncadd [#allocation6], 4294965248 }
  0x15   :  { %657 = dma.done.wait [#allocation9], 1152  }
  0x16   :  { %658 = vsyncadd [#allocation9], 4294966144  ;;  %v479_v0 = vld [vmem:[#allocation5 + $0x38] sm:$0xff]  ;;  %v478_v1 = vld [vmem:[#allocation5 + $0x30] sm:$0xff]  ;;  %s668_s10 = smov [#allocation11]   ;;  %s364_s14 = sshll.u32 %s749_s8, 4  ;;  %s365_s14 = int_to_ptr.hbm [resolvable:$true] %s364_s14 }
  0x17   :  { %173 = vmatpush.bf16.msra.mxu0 %v479_v0  ;;  %v487_v2 = vld [vmem:[#allocation7 + $0x38] sm:$0xff]  ;;  %v486_v4 = vld [vmem:[#allocation7 + $0x30] sm:$0xff]  ;;  %v477_v6 = vld [vmem:[#allocation5 + $0x28] sm:$0xff]  ;;  %s362_s11 = sshll.u32 %s668_s10, 4  ;;  %s363_s11 = int_to_ptr.vmem [resolvable:$true] %s362_s11 }
  0x18   :  { %v495_v3 = vld [vmem:[#allocation8 + $0x38] sm:$0xff]  ;;  %256 = vmatpush.bf16.msra.mxu1 %v487_v2  ;;  %v494_v5 = vld [vmem:[#allocation8 + $0x30] sm:$0xff]  ;;  %v485_v7 = vld [vmem:[#allocation7 + $0x28] sm:$0xff] }
  0x19   :  { %337 = vmatpush.bf16.msra.mxu2 %v495_v3  ;;  %v493_v8 = vld [vmem:[#allocation8 + $0x28] sm:$0xff]  ;;  %v476_v9 = vld [vmem:[#allocation5 + $0x20] sm:$0xff]  ;;  %v475_v12 = vld [vmem:[#allocation5 + $0x18] sm:$0xff] }
  0x1a   :  { %v484_v10 = vld [vmem:[#allocation7 + $0x20] sm:$0xff]  ;;  %v483_v13 = vld [vmem:[#allocation7 + $0x18] sm:$0xff]  ;;  %v474_v15 = vld [vmem:[#allocation5 + $0x10] sm:$0xff] }
  0x1b   :  { %174 = vmatpush.bf16.msra.mxu0 %v478_v1  ;;  %v492_v11 = vld [vmem:[#allocation8 + $0x20] sm:$0xff]  ;;  %v491_v14 = vld [vmem:[#allocation8 + $0x18] sm:$0xff]  ;;  %v482_v16 = vld [vmem:[#allocation7 + $0x10] sm:$0xff] }
  0x1c   :  { %257 = vmatpush.bf16.msra.mxu1 %v486_v4  ;;  %v490_v17 = vld [vmem:[#allocation8 + $0x10] sm:$0xff]  ;;  %v473_v18 = vld [vmem:[#allocation5 + $0x8] sm:$0xff]  ;;  %v472_v19 = vld [vmem:[#allocation5] sm:$0xff] }
  0x1d   :  { %338 = vmatpush.bf16.msra.mxu2 %v494_v5  ;;  %v104_v20 = vld [vmem:[#allocation2] sm:$0xf]  ;;  %v481_v21 = vld [vmem:[#allocation7 + $0x8] sm:$0xff]  ;;  %v480_v23 = vld [vmem:[#allocation7] sm:$0xff] }
  0x1e   :  { %v489_v22 = vld [vmem:[#allocation8 + $0x8] sm:$0xff]  ;;  %v488_v24 = vld [vmem:[#allocation8] sm:$0xff]  ;;  %v504_v25 = vld [vmem:[%s743_s2] ss:$0 sm:$0xff] }
  0x1f   :  { %175 = vmatpush.bf16.msra.mxu0 %v477_v6  ;;  %v506_v32 = vld [vmem:[%s747_s6] ss:$0 sm:$0xff]  ;;  %v353_v40 = vld [vmem:[#allocation10] sm:$0xff] }
  0x20   :  { %258 = vmatpush.bf16.msra.mxu1 %v485_v7  ;;  %v505_v39 = vld [vmem:[%s745_s4] ss:$0 sm:$0xff] }
  0x21   :  { %339 = vmatpush.bf16.msra.mxu2 %v493_v8 }
  0x23   :  { %176 = vmatpush.bf16.msra.mxu0 %v476_v9 }
  0x24   :  { %259 = vmatpush.bf16.msra.mxu1 %v484_v10 }
  0x25   :  { %340 = vmatpush.bf16.msra.mxu2 %v492_v11 }
  0x27   :  { %177 = vmatpush.bf16.msra.mxu0 %v475_v12 }
  0x28   :  { %260 = vmatpush.bf16.msra.mxu1 %v483_v13 }
  0x29   :  { %341 = vmatpush.bf16.msra.mxu2 %v491_v14 }
  0x2b   :  { %178 = vmatpush.bf16.msra.mxu0 %v474_v15 }
  0x2c   :  { %261 = vmatpush.bf16.msra.mxu1 %v482_v16 }
  0x2d   :  { %342 = vmatpush.bf16.msra.mxu2 %v490_v17 }
  0x2f   :  { %179 = vmatpush.bf16.msra.mxu0 %v473_v18 }
  0x30   :  { %262 = vmatpush.bf16.msra.mxu1 %v481_v21 }
  0x31   :  { %343 = vmatpush.bf16.msra.mxu2 %v489_v22 }
  0x33   :  { %180 = vmatpush.bf16.msra.mxu0 %v472_v19 }
  0x34   :  { %263 = vmatpush.bf16.msra.mxu1 %v480_v23 }
  0x35   :  { %344 = vmatpush.bf16.msra.mxu2 %v488_v24 }
  0x36   :  { %181 = vmatmul.bf16.vlgmr.msra.gmra.mxu0 %v104_v20 }
  0xb3   :  { %v182_v26 = vpop.f32.mrf.mxu0 }
  0xb4   :  { %v183_v27 = vadd.f32 %v504_v25, %v182_v26 }
  0xb6   :  { %v186_v28 = vmax.f32 %v183_v27, 0.0 }
  0xb8   :  { %v187_v29 = vpack.c.bf16 %v186_v28, %v186_v28 }
  0xba   :  { %264 = vmatmul.bf16.vlgmr.msra.gmra.mxu1 %v187_v29  ;;  %345 = vmatmul.bf16.vlgmr.msra.gmra.mxu2 %v187_v29 }
  0xbb   :  { %v184_v30 = vpop.f32.mrf.mxu0 }
 0x137   :  { %v265_v31 = vpop.f32.mrf.mxu1 }
 0x138   :  { %v266_v42 = vadd.f32 %v505_v39, %v265_v31 }
 0x13d   :  { %v346_v33 = vpop.f32.mrf.mxu2 }
 0x13e   :  { %v347_v34 = vadd.f32 %v506_v32, %v346_v33 }
 0x13f   :  { %v267_v35 = vpop.f32.mrf.mxu1 }
 0x140   :  { %v350_v36 = vmul.f32 0.5, %v347_v34 }
 0x142   :  { %v351_v37 = vmul.f32 1.442695, %v350_v36 }
 0x144   :  { %507 = vpow2.f32 %v351_v37 }
 0x145   :  { %v348_v38 = vpop.f32.mrf.mxu2 }
 0x14a   :  { %v508_v41 = vpop.eup %507 }
 0x14b   :  { %v354_v43 = vmul.f32 %v508_v41, %v353_v40 }
 0x14d   :  { %v355_v44 = vadd.f32 %v354_v43, %v266_v42 }
 0x14f   :  { %356 = vst [vmem:[#allocation11] sm:$0xff] %v355_v44 }
 0x150   :  { %367 = dma.vmem_to_hbm [thread:$0]  %s363_s11, 128, %s365_s14, [#allocation4]  }
 0x151   :  { %659 = dma.done.wait [#allocation4], 128  }
 0x152   :  { %660 = vsyncadd [#allocation4], 4294967168 }
 0x153   :  { %372 = vsyncpa [#allocation3], 1 }
 0x154   :  { %373 = vsyncpa [#allocation6], 1 }
 0x155   :  { %374 = vsyncpa [#allocation9], 1 }
 0x156   :  { %375 = vsyncpa [#allocation4], 1 }

</bundles_post_ra>
